<compile_context>
chip_gen: v7x
topology: tpu7x:2x2x1
jax: 0.10.0
libtpu: 0.0.40
codegen_flags: <defaults>
</compile_context>

<pallas_src>
import functools
import math

import jax
import jax.numpy as jnp
from jax import lax
from jax.experimental import pallas as pl
from jax.experimental.pallas import tpu as pltpu

EPS = 1e-9
_SMALL_PATH_BYTES = 4 * 1024 * 1024   # gridless path if both grouped inputs fit


def _round_up(x: int, m: int) -> int:
    return (x + m - 1) // m * m


def _device_kind() -> str:
    try:
        return jax.devices()[0].device_kind.lower()
    except Exception:
        return ""


def _tensorcores_per_chip() -> int:
    # v7x has 2 TensorCores per chip; v5e/v6e have 1. Detection is only a
    # heuristic — either value is correct, it just changes the parallel split.
    return 2 if "v7" in _device_kind() else 1


def _vmem_tile_budget_bytes() -> int:
    # Target for the double-buffered *input* footprint, kept under each
    # generation's default scoped-VMEM limit with headroom for the
    # accumulator output + internal scratch (no vmem_limit_bytes flag needed):
    #   v5e: 16 MiB default -> 12 MiB;  v6e/v7x: 32 MiB default -> 24 MiB.
    return (12 if "v5" in _device_kind() else 24) * 1024 * 1024


def _row_align(min_itemsize: int) -> int:
    # Full native sublane tile: 8 rows (32-bit), 16 (16-bit), 32 (8-bit).
    return max(8, 32 // max(int(min_itemsize), 1))


# ----------------------------- gridless (small) path ------------------------
def _sse_small_kernel(preds_ref, target_ref, sse_ref):
    diff = preds_ref[...].astype(jnp.float32) - target_ref[...].astype(jnp.float32)
    sse_ref[...] = jnp.sum(diff * diff, axis=0, keepdims=True)   # (1, cols)


def _sse_small(p: jax.Array, t: jax.Array) -> jax.Array:
    _, cols = p.shape
    return pl.pallas_call(
        _sse_small_kernel,
        out_shape=jax.ShapeDtypeStruct((1, cols), jnp.float32),
        in_specs=[pl.BlockSpec(memory_space=pltpu.MemorySpace.VMEM),
                  pl.BlockSpec(memory_space=pltpu.MemorySpace.VMEM)],
        out_specs=pl.BlockSpec(memory_space=pltpu.MemorySpace.VMEM),
    )(p, t)


# ----------------------------- tiled path -----------------------------------
def _sse_tiled_kernel(preds_ref, target_ref, sse_ref, *,
                      n_rows, tile_rows, tiles_per_core):
    core = pl.program_id(0)
    step = pl.program_id(1)
    blk = core * tiles_per_core + step          # global block index

    @pl.when(step == 0)
    def _init():
        sse_ref[...] = jnp.zeros_like(sse_ref)

    diff = preds_ref[...].astype(jnp.float32) - target_ref[...].astype(jnp.float32)
    sq = diff * diff                            # (tile_rows, lanes) f32

    def _accumulate(x):
        # Fold onto the resident (8, lanes) accumulator: pure full-vreg VALU
        # adds, no cross-sublane (XLU) reduce, unmasked (8,128)-aligned store.
        sse_ref[...] += jnp.sum(x.reshape(tile_rows // 8, 8, x.shape[-1]), axis=0)

    is_full = (blk + 1) * tile_rows <= n_rows

    @pl.when(is_full)
    def _full_tile():                           # common case: no mask ops
        _accumulate(sq)

    @pl.when(jnp.logical_not(is_full))
    def _ragged_tile():                         # last / clamped-OOB tile only
        row = blk * tile_rows + lax.broadcasted_iota(jnp.int32, sq.shape, 0)
        _accumulate(jnp.where(row < n_rows, sq, 0.0))


def _sse_tiled(p: jax.Array, t: jax.Array, tile_rows=None) -> jax.Array:
    ng, lanes = p.shape                         # lanes is a multiple of 128
    in_itemsize = p.dtype.itemsize + t.dtype.itemsize
    align = _row_align(min(p.dtype.itemsize, t.dtype.itemsize))

    if tile_rows is None:
        per_row = 2 * in_itemsize * lanes       # 2 pipeline buffers per input
        tile_rows = _vmem_tile_budget_bytes() // per_row
    tile_rows = int(tile_rows)
    tile_rows = max(align, min(tile_rows, _round_up(ng, align)))
    tile_rows = (tile_rows // align) * align

    tiles_total = pl.cdiv(ng, tile_rows)
    n_cores = _tensorcores_per_chip()
    if tiles_total < 2:
        n_cores = 1
    tiles_per_core = pl.cdiv(tiles_total, n_cores)
    last_blk = tiles_total - 1

    def in_index_map(core, step):
        # Clamp so the (rare) fully-out-of-range trailing block on an odd
        # 2-core split just re-reads the last valid block; the kernel's ragged
        # branch masks its contribution to zero.
        return (jnp.minimum(core * tiles_per_core + step, last_blk), 0)

    kernel = functools.partial(_sse_tiled_kernel, n_rows=ng,
                               tile_rows=tile_rows, tiles_per_core=tiles_per_core)
    # TODO(synk): if a v7x bundle dump shows the VALU slot binding after these
    # fixes, offload the row-fold to the MXU via a ones-row matmul.
    return pl.pallas_call(
        kernel,
        out_shape=jax.ShapeDtypeStruct((8 * n_cores, lanes), jnp.float32),
        grid=(n_cores, tiles_per_core),
        in_specs=[pl.BlockSpec((tile_rows, lanes), in_index_map),
                  pl.BlockSpec((tile_rows, lanes), in_index_map)],
        out_specs=pl.BlockSpec((8, lanes), lambda core, step: (core, 0)),
        compiler_params=pltpu.CompilerParams(
            dimension_semantics=("parallel", "arbitrary")),
    )(p, t)


# ----------------------------- public API -----------------------------------
def mcrmse_loss(preds: jax.Array, target: jax.Array, *,
                force_tiled: bool = False, tile_rows=None) -> jax.Array:
    """Pallas implementation of MCRMSELoss.forward. Returns a scalar f32."""
    assert preds.shape == target.shape
    assert preds.ndim == 2, "expected (batch, num_targets)"
    n, c = preds.shape

    g = 128 // math.gcd(c, 128)          # smallest G with (G*C) % 128 == 0
    n_main = (n // g) * g

    if n_main < 8 * g:
        # Tiny batch: one gridless kernel on the raw (N, C) layout (lane
        # padding is irrelevant at this size).
        col_sse = jnp.sum(_sse_small(preds, target).reshape(-1, c), axis=0)
    else:
        lanes = g * c
        ng = n_main // g
        if n_main == n:
            p_main, t_main = preds, target
        else:
            p_main, t_main = preds[:n_main], target[:n_main]
        p_main = p_main.reshape(ng, lanes)      # free row-major view
        t_main = t_main.reshape(ng, lanes)

        resident = ng * lanes * (preds.dtype.itemsize + target.dtype.itemsize)
        if force_tiled or resident > _SMALL_PATH_BYTES:
            sse = _sse_tiled(p_main, t_main, tile_rows=tile_rows)
        else:
            sse = _sse_small(p_main, t_main)
        # Fold cores / sublanes / lane-groups back to per-column SSE.
        col_sse = jnp.sum(sse.reshape(-1, c), axis=0)

        if n_main < n:
            # < G leftover rows: trivial O(G*C) epilogue in plain jnp.
            rd = (preds[n_main:].astype(jnp.float32)
                  - target[n_main:].astype(jnp.float32))
            col_sse = col_sse + jnp.sum(rd * rd, axis=0)

    # O(C) epilogue: divide by the true batch size once, sqrt(+eps), mean.
    return jnp.mean(jnp.sqrt(col_sse / n + EPS))


def mcrmse_loss_ref(preds: jax.Array, target: jax.Array) -> jax.Array:
    """Pure-JAX reference matching the PyTorch module exactly."""
    mse = (preds - target) ** 2
    return jnp.mean(jnp.sqrt(jnp.mean(mse, axis=0) + EPS), axis=0)


if __name__ == "__main__":
    key = jax.random.PRNGKey(0)
    k1, k2, k3, k4 = jax.random.split(key, 4)

    # Tiny batch (gridless ungrouped path): batch=16, num_targets=6.
    preds = jax.random.normal(k1, (16, 6), dtype=jnp.float32)
    target = jax.random.normal(k2, (16, 6), dtype=jnp.float32)
    loss = mcrmse_loss(preds, target)
    jax.block_until_ready(loss)
    ref = mcrmse_loss_ref(preds, target)
    assert jnp.allclose(loss, ref, rtol=1e-6, atol=1e-6), (loss, ref)

    # Grouped gridless path (lane-dense 384-lane view) + jnp remainder fold.
    preds2 = jax.random.normal(k3, (1000, 6), dtype=jnp.float32)
    target2 = jax.random.normal(k4, (1000, 6), dtype=jnp.float32)
    loss2 = mcrmse_loss(preds2, target2)
    jax.block_until_ready(loss2)
    ref2 = mcrmse_loss_ref(preds2, target2)
    assert jnp.allclose(loss2, ref2, rtol=1e-5, atol=1e-6), (loss2, ref2)

    # Tiled path: multiple grid steps, ragged last tile, remainder fold,
    # (and the 2-TensorCore split when running on v7x).
    loss3 = mcrmse_loss(preds2, target2, force_tiled=True, tile_rows=8)
    jax.block_until_ready(loss3)
    assert jnp.allclose(loss3, ref2, rtol=1e-5, atol=1e-6), (loss3, ref2)

    print("KERNEL_OK")
</pallas_src>

<mosaic_0001>
module attributes {stable_mosaic.version = 11 : i64} {
  func.func @_sse_small_kernel(%arg0: memref<16x6xf32, #tpu.memory_space<vmem>>, %arg1: memref<16x6xf32, #tpu.memory_space<vmem>>, %arg2: memref<1x6xf32, #tpu.memory_space<vmem>>) attributes {dimension_semantics = [], scalar_prefetch = 0 : i64, scratch_operands = 0 : i64, tpu.core_type = #tpu.core_type<tc>} {
    %c0 = arith.constant 0 : index
    %c0_0 = arith.constant 0 : index
    %0 = vector.load %arg0[%c0, %c0_0] : memref<16x6xf32, #tpu.memory_space<vmem>>, vector<16x6xf32>
    %c0_1 = arith.constant 0 : index
    %c0_2 = arith.constant 0 : index
    %1 = vector.load %arg1[%c0_1, %c0_2] : memref<16x6xf32, #tpu.memory_space<vmem>>, vector<16x6xf32>
    %2 = arith.subf %0, %1 : vector<16x6xf32>
    %3 = arith.mulf %2, %2 : vector<16x6xf32>
    %cst = arith.constant dense<0.000000e+00> : vector<6xf32>
    %4 = vector.multi_reduction <add>, %3, %cst [0] : vector<16x6xf32> to vector<6xf32>
    %5 = vector.shape_cast %4 : vector<6xf32> to vector<1x6xf32>
    %c0_3 = arith.constant 0 : index
    %c0_4 = arith.constant 0 : index
    %6 = vector.load %arg2[%c0_3, %c0_4] : memref<1x6xf32, #tpu.memory_space<vmem>>, vector<1x6xf32>
    tpu.vector_store %arg2[%c0_3, %c0_4], %5 {strides = array<i32>} : memref<1x6xf32, #tpu.memory_space<vmem>>, vector<1x6xf32>,
    return
  }
}

</mosaic_0001>

<bundles_post_ra>
// kernel: tpu_custom_call.1
= control target key start
LH: loop header
LB: loop body
LE: loop exit
PB: predicated region body
PF: predicated region fallthrough
CT: control target
= control target key end

     0   :  { %s111_s0 = inlined_call_operand.vmem [shape: f32[16,6], index: 0, kind: input, shape index: {}]   ;;  %s112_s1 = inlined_call_operand.vmem [shape: f32[16,6], index: 1, kind: input, shape index: {}]   ;;  %s113_s2 = inlined_call_operand.hbm [shape: f32[1,6], index: 2, kind: output, shape index: {}]  }
   0x1   :  { %v12_v0 = vld [vmem:[%s111_s0] sm:$0xff]  ;;  %v13_v1 = vld [vmem:[%s111_s0 + $0x8] sm:$0xff] }
   0x2   :  { %v14_v2 = vld [vmem:[%s112_s1] sm:$0xff]  ;;  %v15_v3 = vld [vmem:[%s112_s1 + $0x8] sm:$0xff] }
   0x3   :  { %v16_v4 = vsub.f32 %v12_v0, %v14_v2 }
   0x4   :  { %7 = vsyncpa [#allocation3], 0  ;;  %v17_v5 = vsub.f32 %v13_v1, %v15_v3  ;;  %vm20_vm0 = vcmask 48128   ;;  %s71_s0 = smov [#allocation2]   ;;  %vm30_vm1 = vcmask 40960  }
   0x5   :  { %v18_v6 = vmul.f32 %v16_v4, %v16_v4  ;;  %s38_s17 = sshll.u32 %s71_s0, 4  ;;  %s39_s17 = int_to_ptr.vmem [resolvable:$true] %s38_s17 }
   0x6   :  { %v19_v7 = vmul.f32 %v17_v5, %v17_v5  ;;  %s47_s1 = scalar_lea.vmem %s39_s17, 16  ;;  %s51_s18 = scalar_lea.vmem %s39_s17, 32 }
   0x7   :  { %v21_v8 = vsel %vm20_vm0, %v18_v6, 0.0  ;;  %p48_p0 = scmp.ne.s32.totalorder %s39_s17, %s47_s1  ;;  %p52_p1 = scmp.lt.s32.totalorder %s39_s17, %s39_s17 }
   0x8   :  { %v22_v9 = vsel %vm20_vm0, %v19_v7, 0.0  ;;  %p53_p2 = scmp.lt.s32.totalorder %s51_s18, %s47_s1 }
   0x9   :  { %v23_v10 = vadd.f32 %v22_v9, %v21_v8 }
   0xa   :  { %p54_p3 = por %p53_p2, %p52_p1 }
   0xb   :  { %v24_v11 = vrot.slane %v23_v10, 4 }
   0xc   :  { %p55_p4 = pnand %p54_p3, %p48_p0 }
   0xd   :  { %v25_v12 = vadd.f32 %v24_v11, %v23_v10 }
   0xf   :  { %v26_v13 = vrot.slane %v25_v12, 2 }
  0x11   :  { %v27_v14 = vadd.f32 %v26_v13, %v25_v12 }
  0x13   :  { %v28_v15 = vrot.slane %v27_v14, 1 }
  0x15   :  { %v29_v16 = vadd.f32 %v28_v15, %v27_v14 }
  0x17   :  { %31 = vst.msk [vmem:[#allocation2] sm:$0x1] %vm30_vm1, %v29_v16 }
  0x18   :  { %58 = shalt.err (!%p55_p4)
}
  0x19   :  { %s59_s21 = scalar_lea.hbm %s113_s2, 16 }
  0x1a   :  { %p60_p5 = scmp.ne.s32.totalorder %s113_s2, %s59_s21  ;;  %p63_p6 = scmp.lt.u32.totalorder %s59_s21, %s113_s2 }
  0x1c   :  { %p65_p7 = pnand %p63_p6, %p60_p5 }
  0x1e   :  { %68 = shalt.err (!%p65_p7)
}
  0x1f   :  { %41 = dma.vmem_to_hbm [thread:$0]  %s39_s17, 16, %s113_s2, [#allocation3]  }
  0x20   :  { %69 = dma.done.wait [#allocation3], 16  }
  0x21   :  { %70 = vsyncadd [#allocation3], 4294967280 }
  0x22   :  { %45 = vsyncpa [#allocation3], 1 }

</bundles_post_ra>
